<compile_context>
chip_gen: v7x
topology: tpu7x:2x2x1
jax: 0.10.0
libtpu: 0.0.40
codegen_flags: <defaults>
</compile_context>

<pallas_src>
from functools import partial

import jax
import jax.numpy as jnp
from jax import lax
from jax.experimental import pallas as pl
from jax.experimental.pallas import tpu as pltpu


_VMEM_LIMIT = 64 * 1024 * 1024  # explicit scoped-VMEM limit (fits v5e/v6e/v7x)


def _largest_divisor_leq(n, cap):
    cap = max(1, min(n, cap))
    for d in range(cap, 0, -1):
        if n % d == 0:
            return d
    return 1


# ---------------------------------------------------------------------------
# use_conv=True: fused upsample+conv via subpixel decomposition
# ---------------------------------------------------------------------------

def _fold_subpixel_weights(weight):
    """Fold a (C, C, 3, 3) conv weight into (9, 4C, C) per-tap / per-phase weights.

    out[co, 2i+dy, 2j+dx] = b[co] + sum_{t,ci} W9[t, p*C+co, ci]
                                   * x_pad[ci, i+oy(t), j+ox(t)],   p = 2*dy+dx
    with x_pad the low-res input zero-padded by 1 and t = 3*oy + ox.
    """
    C = weight.shape[0]
    w = weight.astype(jnp.float32)
    # For output phase dy, conv tap ky reads padded low-res row offset:
    #   dy=0: ky -> (0, 1, 1)    dy=1: ky -> (1, 1, 2)   (same mapping for dx/kx)
    idx_map = {0: (0, 1, 1), 1: (1, 1, 2)}
    phase_blocks = []
    for dy in (0, 1):
        for dx in (0, 1):
            we = jnp.zeros((3, 3, C, C), jnp.float32)      # (oy, ox, co, ci)
            for ky in range(3):
                for kx in range(3):
                    we = we.at[idx_map[dy][ky], idx_map[dx][kx]].add(w[:, :, ky, kx])
            phase_blocks.append(we)
    ws = jnp.stack(phase_blocks, axis=0)                   # (4, 3, 3, C, C)
    ws = ws.transpose(1, 2, 0, 3, 4)                       # (3, 3, 4, C, C)
    return ws.reshape(9, 4 * C, C)                         # (tap, phase*C+co, ci)


def _make_fused_conv_kernel(Wp, TH, TCO):
    THWp = TH * Wp

    def kernel(xt_ref, w_ref, b_ref, o_ref):
        # xt_ref: (C, (TH+3)*Wp)  bf16 padded row-tile (with halo), rows flattened
        # w_ref:  (9, TCO, C)     bf16 folded per-tap weights for this co-tile
        # b_ref:  (TCO, 1)        f32 bias column
        # o_ref:  (TCO, TH*Wp)    f32 lane-dense phase-major output row slab
        acc = None
        for oy in range(3):
            for ox in range(3):
                t = 3 * oy + ox
                base = oy * Wp + ox                         # static slice offsets
                d = jnp.dot(w_ref[t], xt_ref[:, base:base + THWp],
                            preferred_element_type=jnp.float32)
                acc = d if acc is None else acc + d
        o_ref[...] = (acc + b_ref[...]).astype(o_ref.dtype)

    return kernel


@partial(jax.jit, static_argnames=("row_tile", "co_tile"))
def upsample_conv_forward(x, weight, bias, *, row_tile=None, co_tile=None):
    N, C, H, W = x.shape
    Wp = W + 2                                   # padded row stride
    FC = 4 * C                                   # phase-major output channels

    # --- tile sizes ---------------------------------------------------------
    if row_tile is None:
        TH = H if H * Wp <= 4096 else _largest_divisor_leq(H, max(8, 2048 // Wp))
    else:
        TH = row_tile
    assert H % TH == 0, (H, TH)
    if co_tile is None:
        TCO = _largest_divisor_leq(FC, 256)
        if TCO % 8 != 0 and TCO != FC:
            TCO = FC
    else:
        TCO = co_tile
    assert FC % TCO == 0 and (TCO % 8 == 0 or TCO == FC), (FC, TCO)

    n_rt = H // TH
    n_co = FC // TCO
    L = (TH + 3) * Wp                            # tile rows + 3 halo rows, flattened
    THWp = TH * Wp

    # --- operands (bf16 MXU operands, f32 accumulation) ----------------------
    # 1 top pad row, 2 bottom pad rows (extra row keeps flat tap slices in-bounds).
    xpad = jnp.pad(x.astype(jnp.bfloat16), ((0, 0), (0, 0), (1, 2), (1, 1)))
    if n_rt == 1:
        xt = xpad.reshape(N, 1, C, L)
    else:
        tiles = [xpad[:, :, r * TH:r * TH + TH + 3, :] for r in range(n_rt)]
        xt = jnp.stack(tiles, axis=1).reshape(N, n_rt, C, L)

    w9 = _fold_subpixel_weights(weight).astype(jnp.bfloat16)       # (9, 4C, C)
    b4 = jnp.tile(bias.astype(jnp.float32), 4).reshape(FC, 1)      # (4C, 1)

    kernel = _make_fused_conv_kernel(Wp, TH, TCO)
    o = pl.pallas_call(
        kernel,
        out_shape=jax.ShapeDtypeStruct((N, n_rt, FC, THWp), jnp.float32),
        grid=(N, n_rt, n_co),
        in_specs=[
            # input row-tile: constant across the innermost co axis -> DMA'd once
            pl.BlockSpec((None, None, C, L), lambda n, r, co: (n, r, 0, 0)),
            # only a (9, TCO, C) weight slice is resident per step
            pl.BlockSpec((9, TCO, C), lambda n, r, co: (0, co, 0)),
            pl.BlockSpec((TCO, 1), lambda n, r, co: (co, 0)),
        ],
        out_specs=pl.BlockSpec((None, None, TCO, THWp),
                               lambda n, r, co: (n, r, co, 0)),
        compiler_params=pltpu.CompilerParams(
            dimension_semantics=("parallel", "parallel", "parallel"),
            vmem_limit_bytes=_VMEM_LIMIT),
    )(xt, w9, b4)

    # Phase interleave + junk-column drop: one fused XLA copy.
    o = o.reshape(N, n_rt, 2, 2, C, TH, Wp)[..., :W]   # (N, rt, dy, dx, C, i, j)
    o = o.transpose(0, 4, 1, 5, 2, 6, 3).reshape(N, C, 2 * H, 2 * W)
    return o.astype(x.dtype)


# ---------------------------------------------------------------------------
# use_conv=False: pure nearest 2x upsample (one lane-dense MXU matmul per tile)
# ---------------------------------------------------------------------------

def _nearest_kernel(x_ref, d_ref, o_ref):
    # x_ref: (TCH, W) f32 ; d_ref: (W, 4W) f32 0/1 ; o_ref: (TCH, 4W)
    # d encodes both column duplication and (via the doubled lane block) row
    # duplication, so the result is exact and the epilogue is a free reshape.
    o_ref[...] = jnp.dot(x_ref[...], d_ref[...],
                         preferred_element_type=jnp.float32).astype(o_ref.dtype)


@partial(jax.jit, static_argnames=("ch_tile",))
def upsample_nearest_forward(x, *, ch_tile=None):
    N, C, H, W = x.shape
    CH = C * H
    if ch_tile is None:
        TCH = _largest_divisor_leq(CH, 2048)
        if TCH % 8 != 0 and TCH != CH:
            TCH = CH
    else:
        TCH = ch_tile
    assert CH % TCH == 0 and (TCH % 8 == 0 or TCH == CH), (CH, TCH)
    n_t = CH // TCH

    x2 = x.reshape(N, CH, W).astype(jnp.float32)          # free contiguous reshape
    col = jnp.arange(2 * W)
    dup = (jnp.arange(W)[:, None] == (col[None, :] // 2)).astype(jnp.float32)
    dup2 = jnp.concatenate([dup, dup], axis=1)            # (W, 4W)

    o = pl.pallas_call(
        _nearest_kernel,
        out_shape=jax.ShapeDtypeStruct((N, CH, 4 * W), jnp.float32),
        grid=(N, n_t),
        in_specs=[
            pl.BlockSpec((None, TCH, W), lambda n, t: (n, t, 0)),
            pl.BlockSpec((W, 4 * W), lambda n, t: (0, 0)),
        ],
        out_specs=pl.BlockSpec((None, TCH, 4 * W), lambda n, t: (n, t, 0)),
        compiler_params=pltpu.CompilerParams(
            dimension_semantics=("parallel", "parallel"),
            vmem_limit_bytes=_VMEM_LIMIT),
    )(x2, dup2)

    # (N, C*H, [row0 | row1]) -> (N, C, 2H, 2W): contiguous split, no transpose.
    return o.reshape(N, C, 2 * H, 2 * W).astype(x.dtype)


def upsample_forward(x, weight=None, bias=None, *, use_conv=True, **tiles):
    """Pallas equivalent of Upsample.forward:
    F.interpolate(scale=2, mode='nearest') [+ Conv2d(C, C, 3, padding=1)]."""
    if use_conv:
        return upsample_conv_forward(x, weight, bias, **tiles)
    return upsample_nearest_forward(x, **tiles)


# ---------------------------------------------------------------------------
# reference + self-test
# ---------------------------------------------------------------------------

def _reference(x, weight, bias, use_conv):
    up = jnp.repeat(jnp.repeat(x, 2, axis=2), 2, axis=3)
    if not use_conv:
        return up
    out = lax.conv_general_dilated(
        up, weight, window_strides=(1, 1), padding=((1, 1), (1, 1)),
        dimension_numbers=("NCHW", "OIHW", "NCHW"),
        precision=lax.Precision.HIGHEST)
    return out + bias[None, :, None, None]


if __name__ == "__main__":
    key = jax.random.PRNGKey(0)
    kx, kw, kb = jax.random.split(key, 3)

    N, C, H, W = 2, 4, 16, 16
    x = jax.random.normal(kx, (N, C, H, W), dtype=jnp.float32)

    # Deterministic Conv2d(channels, channels, 3, padding=1) params
    # (PyTorch-style uniform(-1/sqrt(fan_in), 1/sqrt(fan_in)) init).
    fan_in = C * 3 * 3
    bound = 1.0 / (fan_in ** 0.5)
    weight = jax.random.uniform(kw, (C, C, 3, 3), minval=-bound, maxval=bound,
                                dtype=jnp.float32)
    bias = jax.random.uniform(kb, (C,), minval=-bound, maxval=bound,
                              dtype=jnp.float32)

    # --- use_conv=True (bf16 MXU operands, f32 accumulation) ----------------
    ref_c = _reference(x, weight, bias, True)

    out1 = jax.block_until_ready(upsample_forward(x, weight, bias, use_conv=True))
    assert out1.shape == (N, C, 2 * H, 2 * W)
    err1 = float(jnp.max(jnp.abs(out1 - ref_c)))
    assert err1 < 1e-1, err1

    # Same path with explicit row / output-channel tiling exercised.
    out2 = jax.block_until_ready(
        upsample_forward(x, weight, bias, use_conv=True, row_tile=8, co_tile=8))
    err2 = float(jnp.max(jnp.abs(out2 - ref_c)))
    assert err2 < 1e-1, err2

    # --- use_conv=False (exact) ---------------------------------------------
    ref_n = _reference(x, None, None, False)

    out3 = jax.block_until_ready(upsample_forward(x, use_conv=False))
    assert out3.shape == (N, C, 2 * H, 2 * W)
    assert float(jnp.max(jnp.abs(out3 - ref_n))) < 1e-6

    out4 = jax.block_until_ready(upsample_forward(x, use_conv=False, ch_tile=16))
    assert float(jnp.max(jnp.abs(out4 - ref_n))) < 1e-6

    print("KERNEL_OK")
</pallas_src>

<mosaic_0001>
module attributes {stable_mosaic.version = 11 : i64} {
  func.func @kernel(%arg0: i32, %arg1: i32, %arg2: i32, %arg3: memref<1x1x4x342xbf16, #tpu.memory_space<vmem>>, %arg4: memref<9x16x4xbf16, #tpu.memory_space<vmem>>, %arg5: memref<16x1xf32, #tpu.memory_space<vmem>>, %arg6: memref<1x1x16x288xf32, #tpu.memory_space<vmem>>) attributes {dimension_semantics = [#tpu.dimension_semantics<parallel>, #tpu.dimension_semantics<parallel>, #tpu.dimension_semantics<parallel>], iteration_bounds = array<i64: 2, 1, 1>, scalar_prefetch = 0 : i64, scratch_operands = 0 : i64, tpu.core_type = #tpu.core_type<tc>, window_params = [{transform_indices = @transform_0, window_bounds = array<i64: 1, 1, 4, 342>}, {transform_indices = @transform_1, window_bounds = array<i64: 9, 16, 4>}, {transform_indices = @transform_2, window_bounds = array<i64: 16, 1>}, {transform_indices = @transform_3, window_bounds = array<i64: 1, 1, 16, 288>}]} {
    %c0 = arith.constant 0 : index
    %c0_0 = arith.constant 0 : index
    %c0_1 = arith.constant 0 : index
    %0 = vector.load %arg4[%c0, %c0_0, %c0_1] : memref<9x16x4xbf16, #tpu.memory_space<vmem>>, vector<1x16x4xbf16>
    %1 = vector.shape_cast %0 : vector<1x16x4xbf16> to vector<16x4xbf16>
    %c0_2 = arith.constant 0 : index
    %c0_3 = arith.constant 0 : index
    %c0_4 = arith.constant 0 : index
    %c0_5 = arith.constant 0 : index
    %2 = vector.load %arg3[%c0_2, %c0_3, %c0_4, %c0_5] : memref<1x1x4x342xbf16, #tpu.memory_space<vmem>>, vector<1x1x4x288xbf16>
    %3 = vector.shape_cast %2 : vector<1x1x4x288xbf16> to vector<4x288xbf16>
    %cst = arith.constant dense<0.000000e+00> : vector<16x288xf32>
    %4 = tpu.matmul %1, %3, %cst {dimension_numbers = #tpu.dot_dimension_numbers<[1], [0], [0], [1], [0, 0, 1, 1], [], []>} : vector<16x4xbf16>, vector<4x288xbf16>, vector<16x288xf32> -> vector<16x288xf32>
    %c1 = arith.constant 1 : index
    %c0_6 = arith.constant 0 : index
    %c0_7 = arith.constant 0 : index
    %5 = vector.load %arg4[%c1, %c0_6, %c0_7] : memref<9x16x4xbf16, #tpu.memory_space<vmem>>, vector<1x16x4xbf16>
    %6 = vector.shape_cast %5 : vector<1x16x4xbf16> to vector<16x4xbf16>
    %c0_8 = arith.constant 0 : index
    %c0_9 = arith.constant 0 : index
    %c0_10 = arith.constant 0 : index
    %c1_11 = arith.constant 1 : index
    %7 = vector.load %arg3[%c0_8, %c0_9, %c0_10, %c1_11] : memref<1x1x4x342xbf16, #tpu.memory_space<vmem>>, vector<1x1x4x288xbf16>
    %8 = vector.shape_cast %7 : vector<1x1x4x288xbf16> to vector<4x288xbf16>
    %cst_12 = arith.constant dense<0.000000e+00> : vector<16x288xf32>
    %9 = tpu.matmul %6, %8, %cst_12 {dimension_numbers = #tpu.dot_dimension_numbers<[1], [0], [0], [1], [0, 0, 1, 1], [], []>} : vector<16x4xbf16>, vector<4x288xbf16>, vector<16x288xf32> -> vector<16x288xf32>
    %10 = arith.addf %4, %9 : vector<16x288xf32>
    %c2 = arith.constant 2 : index
    %c0_13 = arith.constant 0 : index
    %c0_14 = arith.constant 0 : index
    %11 = vector.load %arg4[%c2, %c0_13, %c0_14] : memref<9x16x4xbf16, #tpu.memory_space<vmem>>, vector<1x16x4xbf16>
    %12 = vector.shape_cast %11 : vector<1x16x4xbf16> to vector<16x4xbf16>
    %c0_15 = arith.constant 0 : index
    %c0_16 = arith.constant 0 : index
    %c0_17 = arith.constant 0 : index
    %c2_18 = arith.constant 2 : index
    %13 = vector.load %arg3[%c0_15, %c0_16, %c0_17, %c2_18] : memref<1x1x4x342xbf16, #tpu.memory_space<vmem>>, vector<1x1x4x288xbf16>
    %14 = vector.shape_cast %13 : vector<1x1x4x288xbf16> to vector<4x288xbf16>
    %cst_19 = arith.constant dense<0.000000e+00> : vector<16x288xf32>
    %15 = tpu.matmul %12, %14, %cst_19 {dimension_numbers = #tpu.dot_dimension_numbers<[1], [0], [0], [1], [0, 0, 1, 1], [], []>} : vector<16x4xbf16>, vector<4x288xbf16>, vector<16x288xf32> -> vector<16x288xf32>
    %16 = arith.addf %10, %15 : vector<16x288xf32>
    %c3 = arith.constant 3 : index
    %c0_20 = arith.constant 0 : index
    %c0_21 = arith.constant 0 : index
    %17 = vector.load %arg4[%c3, %c0_20, %c0_21] : memref<9x16x4xbf16, #tpu.memory_space<vmem>>, vector<1x16x4xbf16>
    %18 = vector.shape_cast %17 : vector<1x16x4xbf16> to vector<16x4xbf16>
    %c0_22 = arith.constant 0 : index
    %c0_23 = arith.constant 0 : index
    %c0_24 = arith.constant 0 : index
    %c18 = arith.constant 18 : index
    %19 = vector.load %arg3[%c0_22, %c0_23, %c0_24, %c18] : memref<1x1x4x342xbf16, #tpu.memory_space<vmem>>, vector<1x1x4x288xbf16>
    %20 = vector.shape_cast %19 : vector<1x1x4x288xbf16> to vector<4x288xbf16>
    %cst_25 = arith.constant dense<0.000000e+00> : vector<16x288xf32>
    %21 = tpu.matmul %18, %20, %cst_25 {dimension_numbers = #tpu.dot_dimension_numbers<[1], [0], [0], [1], [0, 0, 1, 1], [], []>} : vector<16x4xbf16>, vector<4x288xbf16>, vector<16x288xf32> -> vector<16x288xf32>
    %22 = arith.addf %16, %21 : vector<16x288xf32>
    %c4 = arith.constant 4 : index
    %c0_26 = arith.constant 0 : index
    %c0_27 = arith.constant 0 : index
    %23 = vector.load %arg4[%c4, %c0_26, %c0_27] : memref<9x16x4xbf16, #tpu.memory_space<vmem>>, vector<1x16x4xbf16>
    %24 = vector.shape_cast %23 : vector<1x16x4xbf16> to vector<16x4xbf16>
    %c0_28 = arith.constant 0 : index
    %c0_29 = arith.constant 0 : index
    %c0_30 = arith.constant 0 : index
    %c19 = arith.constant 19 : index
    %25 = vector.load %arg3[%c0_28, %c0_29, %c0_30, %c19] : memref<1x1x4x342xbf16, #tpu.memory_space<vmem>>, vector<1x1x4x288xbf16>
    %26 = vector.shape_cast %25 : vector<1x1x4x288xbf16> to vector<4x288xbf16>
    %cst_31 = arith.constant dense<0.000000e+00> : vector<16x288xf32>
    %27 = tpu.matmul %24, %26, %cst_31 {dimension_numbers = #tpu.dot_dimension_numbers<[1], [0], [0], [1], [0, 0, 1, 1], [], []>} : vector<16x4xbf16>, vector<4x288xbf16>, vector<16x288xf32> -> vector<16x288xf32>
    %28 = arith.addf %22, %27 : vector<16x288xf32>
    %c5 = arith.constant 5 : index
    %c0_32 = arith.constant 0 : index
    %c0_33 = arith.constant 0 : index
    %29 = vector.load %arg4[%c5, %c0_32, %c0_33] : memref<9x16x4xbf16, #tpu.memory_space<vmem>>, vector<1x16x4xbf16>
    %30 = vector.shape_cast %29 : vector<1x16x4xbf16> to vector<16x4xbf16>
    %c0_34 = arith.constant 0 : index
    %c0_35 = arith.constant 0 : index
    %c0_36 = arith.constant 0 : index
    %c20 = arith.constant 20 : index
    %31 = vector.load %arg3[%c0_34, %c0_35, %c0_36, %c20] : memref<1x1x4x342xbf16, #tpu.memory_space<vmem>>, vector<1x1x4x288xbf16>
    %32 = vector.shape_cast %31 : vector<1x1x4x288xbf16> to vector<4x288xbf16>
    %cst_37 = arith.constant dense<0.000000e+00> : vector<16x288xf32>
    %33 = tpu.matmul %30, %32, %cst_37 {dimension_numbers = #tpu.dot_dimension_numbers<[1], [0], [0], [1], [0, 0, 1, 1], [], []>} : vector<16x4xbf16>, vector<4x288xbf16>, vector<16x288xf32> -> vector<16x288xf32>
    %34 = arith.addf %28, %33 : vector<16x288xf32>
    %c6 = arith.constant 6 : index
    %c0_38 = arith.constant 0 : index
    %c0_39 = arith.constant 0 : index
    %35 = vector.load %arg4[%c6, %c0_38, %c0_39] : memref<9x16x4xbf16, #tpu.memory_space<vmem>>, vector<1x16x4xbf16>
    %36 = vector.shape_cast %35 : vector<1x16x4xbf16> to vector<16x4xbf16>
    %c0_40 = arith.constant 0 : index
    %c0_41 = arith.constant 0 : index
    %c0_42 = arith.constant 0 : index
    %c36 = arith.constant 36 : index
    %37 = vector.load %arg3[%c0_40, %c0_41, %c0_42, %c36] : memref<1x1x4x342xbf16, #tpu.memory_space<vmem>>, vector<1x1x4x288xbf16>
    %38 = vector.shape_cast %37 : vector<1x1x4x288xbf16> to vector<4x288xbf16>
    %cst_43 = arith.constant dense<0.000000e+00> : vector<16x288xf32>
    %39 = tpu.matmul %36, %38, %cst_43 {dimension_numbers = #tpu.dot_dimension_numbers<[1], [0], [0], [1], [0, 0, 1, 1], [], []>} : vector<16x4xbf16>, vector<4x288xbf16>, vector<16x288xf32> -> vector<16x288xf32>
    %40 = arith.addf %34, %39 : vector<16x288xf32>
    %c7 = arith.constant 7 : index
    %c0_44 = arith.constant 0 : index
    %c0_45 = arith.constant 0 : index
    %41 = vector.load %arg4[%c7, %c0_44, %c0_45] : memref<9x16x4xbf16, #tpu.memory_space<vmem>>, vector<1x16x4xbf16>
    %42 = vector.shape_cast %41 : vector<1x16x4xbf16> to vector<16x4xbf16>
    %c0_46 = arith.constant 0 : index
    %c0_47 = arith.constant 0 : index
    %c0_48 = arith.constant 0 : index
    %c37 = arith.constant 37 : index
    %43 = vector.load %arg3[%c0_46, %c0_47, %c0_48, %c37] : memref<1x1x4x342xbf16, #tpu.memory_space<vmem>>, vector<1x1x4x288xbf16>
    %44 = vector.shape_cast %43 : vector<1x1x4x288xbf16> to vector<4x288xbf16>
    %cst_49 = arith.constant dense<0.000000e+00> : vector<16x288xf32>
    %45 = tpu.matmul %42, %44, %cst_49 {dimension_numbers = #tpu.dot_dimension_numbers<[1], [0], [0], [1], [0, 0, 1, 1], [], []>} : vector<16x4xbf16>, vector<4x288xbf16>, vector<16x288xf32> -> vector<16x288xf32>
    %46 = arith.addf %40, %45 : vector<16x288xf32>
    %c8 = arith.constant 8 : index
    %c0_50 = arith.constant 0 : index
    %c0_51 = arith.constant 0 : index
    %47 = vector.load %arg4[%c8, %c0_50, %c0_51] : memref<9x16x4xbf16, #tpu.memory_space<vmem>>, vector<1x16x4xbf16>
    %48 = vector.shape_cast %47 : vector<1x16x4xbf16> to vector<16x4xbf16>
    %c0_52 = arith.constant 0 : index
    %c0_53 = arith.constant 0 : index
    %c0_54 = arith.constant 0 : index
    %c38 = arith.constant 38 : index
    %49 = vector.load %arg3[%c0_52, %c0_53, %c0_54, %c38] : memref<1x1x4x342xbf16, #tpu.memory_space<vmem>>, vector<1x1x4x288xbf16>
    %50 = vector.shape_cast %49 : vector<1x1x4x288xbf16> to vector<4x288xbf16>
    %cst_55 = arith.constant dense<0.000000e+00> : vector<16x288xf32>
    %51 = tpu.matmul %48, %50, %cst_55 {dimension_numbers = #tpu.dot_dimension_numbers<[1], [0], [0], [1], [0, 0, 1, 1], [], []>} : vector<16x4xbf16>, vector<4x288xbf16>, vector<16x288xf32> -> vector<16x288xf32>
    %52 = arith.addf %46, %51 : vector<16x288xf32>
    %c0_56 = arith.constant 0 : index
    %c0_57 = arith.constant 0 : index
    %53 = vector.load %arg5[%c0_56, %c0_57] : memref<16x1xf32, #tpu.memory_space<vmem>>, vector<16x1xf32>
    %54 = vector.broadcast %53 : vector<16x1xf32> to vector<16x288xf32>
    %55 = arith.addf %52, %54 : vector<16x288xf32>
    %c0_58 = arith.constant 0 : index
    %c0_59 = arith.constant 0 : index
    %c0_60 = arith.constant 0 : index
    %c0_61 = arith.constant 0 : index
    %56 = vector.load %arg6[%c0_58, %c0_59, %c0_60, %c0_61] : memref<1x1x16x288xf32, #tpu.memory_space<vmem>>, vector<1x1x16x288xf32>
    %57 = vector.shape_cast %56 : vector<1x1x16x288xf32> to vector<16x288xf32>
    %58 = vector.shape_cast %55 : vector<16x288xf32> to vector<1x1x16x288xf32>
    tpu.vector_store %arg6[%c0_58, %c0_59, %c0_60, %c0_61], %58 {strides = array<i32>} : memref<1x1x16x288xf32, #tpu.memory_space<vmem>>, vector<1x1x16x288xf32>,
    return
  }
  func.func @transform_0(%arg0: i32, %arg1: i32, %arg2: i32) -> (i32, i32, i32, i32) {
    %c0_i32 = arith.constant 0 : i32
    %c0_i32_0 = arith.constant 0 : i32
    %c0_i32_1 = arith.constant 0 : i32
    return %arg0, %arg1, %c0_i32, %c0_i32_0 : i32, i32, i32, i32
  }
  func.func @transform_1(%arg0: i32, %arg1: i32, %arg2: i32) -> (i32, i32, i32) {
    %c0_i32 = arith.constant 0 : i32
    %c0_i32_0 = arith.constant 0 : i32
    %c0_i32_1 = arith.constant 0 : i32
    return %c0_i32, %arg2, %c0_i32_0 : i32, i32, i32
  }
  func.func @transform_2(%arg0: i32, %arg1: i32, %arg2: i32) -> (i32, i32) {
    %c0_i32 = arith.constant 0 : i32
    %c0_i32_0 = arith.constant 0 : i32
    return %arg2, %c0_i32 : i32, i32
  }
  func.func @transform_3(%arg0: i32, %arg1: i32, %arg2: i32) -> (i32, i32, i32, i32) {
    %c0_i32 = arith.constant 0 : i32
    %c0_i32_0 = arith.constant 0 : i32
    return %arg0, %arg1, %arg2, %c0_i32 : i32, i32, i32, i32
  }
}

</mosaic_0001>

<bundles_post_ra>
// kernel: tile.8
= control target key start
LH: loop header
LB: loop body
LE: loop exit
PB: predicated region body
PF: predicated region fallthrough
CT: control target
= control target key end

     0   :  { %s22_s0 = inlined_call_operand.vmem [shape: f32[4], index: 0, kind: input, shape index: {}]   ;;  %s23_s1 = inlined_call_operand.vmem [shape: f32[4,4], index: 1, kind: output, shape index: {}]  }
   0x1   :  { %v4_v0 = vld [vmem:[%s22_s0] ss:$0 sm:$0xff] }
   0x2   :  { %5 = vst [vmem:[%s23_s1] sm:$0xf] %v4_v0 }

// kernel: tile.0
= control target key start
LH: loop header
LB: loop body
LE: loop exit
PB: predicated region body
PF: predicated region fallthrough
CT: control target
= control target key end

     0   :  { %s95_s0 = inlined_call_operand.vmem [shape: f32[4,4], index: 0, kind: input, shape index: {}]   ;;  %s96_s1 = inlined_call_operand.hbm [shape: f32[16,1], index: 1, kind: output, shape index: {}]  }
   0x1   :  { %v5_v0 = vld [vmem:[%s95_s0] sm:$0xf] }
   0x2   :  { %6 = vst [vmem:[#allocation2] sm:$0xf] %v5_v0 }
   0x3   :  { %2 = vsyncpa [#allocation1], 0  ;;  %s66_s0 = smov 127   ;;  %s67_s8 = smov 125   ;;  %vm8_vm0 = vcmask 7168  }
   0x4   :  { %s68_s9 = smov 126   ;;  %s69_s10 = smov [#allocation0]  }
   0x5   :  { %s32_s11 = sshll.u32 %s69_s10, 4  ;;  %s33_s11 = int_to_ptr.vmem [resolvable:$true] %s32_s11 }
   0x6   :  { %s42_s12 = scalar_lea.vmem %s33_s11, 256  ;;  %p47_p1 = scmp.lt.s32.totalorder %s33_s11, %s33_s11 }
   0x7   :  { %p43_p0 = scmp.ne.s32.totalorder %s33_s11, %s42_s12  ;;  %p48_p2 = scmp.lt.s32.totalorder %s42_s12, %s42_s12 }
   0x9   :  { %v10_v1 = vld [vmem:[#allocation2] sm:$0xf]   ;;  %p49_p3 = por %p48_p2, %p47_p1 }
   0xa   :  { %v22_v2 = vld [vmem:[#allocation2] sm:$0xf]   ;;  %11 = vrot.lane.b32.xlu0 %v10_v1, %s66_s0 }
   0xb   :  { %23 = vrot.lane.b32.xlu1 %v22_v2, %s67_s8  ;;  %v7_v3 = vld [vmem:[#allocation2] sm:$0xf]   ;;  %p50_p4 = pnand %p49_p3, %p43_p0 }
   0xc   :  { %v16_v4 = vld [vmem:[#allocation2] sm:$0xf]   ;;  %9 = vst.msk [vmem:[#allocation0] ss:$4 sm:$0xf] %vm8_vm0, %v7_v3  }
   0xe   :  { %17 = vrot.lane.b32.xlu0 %v16_v4, %s68_s9 }
  0x7c   :  { %v12_v5 = vpop.permute.xlu0 %11  }
  0x7d   :  { %v24_v6 = vpop.permute.xlu1 %23   ;;  %15 = vst.msk [vmem:[#allocation0 + $0x1] ss:$4 sm:$0xf] %vm8_vm0, %v12_v5  }
  0x7e   :  { %27 = vst.msk [vmem:[#allocation0 + $0x3] ss:$4 sm:$0xf] %vm8_vm0, %v24_v6  }
  0x80   :  { %v18_v7 = vpop.permute.xlu0 %17  }
  0x81   :  { %21 = vst.msk [vmem:[#allocation0 + $0x2] ss:$4 sm:$0xf] %vm8_vm0, %v18_v7  }
  0x82   :  { %53 = shalt.err (!%p50_p4)
}
  0x83   :  { %s54_s15 = scalar_lea.hbm %s96_s1, 256 }
  0x84   :  { %p55_p5 = scmp.ne.s32.totalorder %s96_s1, %s54_s15  ;;  %p58_p6 = scmp.lt.u32.totalorder %s54_s15, %s96_s1 }
  0x86   :  { %p60_p7 = pnand %p58_p6, %p55_p5 }
  0x88   :  { %63 = shalt.err (!%p60_p7)
}
  0x89   :  { %35 = dma.vmem_to_hbm [thread:$0]  %s33_s11, 256, %s96_s1, [#allocation1]  }
  0x8a   :  { %64 = dma.done.wait [#allocation1], 256  }
  0x8b   :  { %65 = vsyncadd [#allocation1], 4294967040 }
  0x8c   :  { %37 = vsyncpa [#allocation1], 1 }

// kernel: upsample_conv_forward.1
= control target key start
LH: loop header
LB: loop body
LE: loop exit
PB: predicated region body
PF: predicated region fallthrough
CT: control target
= control target key end

     0   :  { %8 = vsyncpa [#allocation3], 0  ;;  %s2497_s0 = inlined_call_operand.hbm [shape: bf16[2,1,4,342], index: 0, kind: input, shape index: {}]   ;;  %s2498_s1 = inlined_call_operand.hbm [shape: bf16[9,16,4], index: 1, kind: input, shape index: {}]   ;;  %s2499_s2 = inlined_call_operand.hbm [shape: f32[16,1], index: 2, kind: input, shape index: {}]   ;;  %s2500_s3 = inlined_call_operand.hbm [shape: f32[2,1,16,288], index: 3, kind: output, shape index: {}]  }
   0x1   :  { %10 = vsyncpa [#allocation3 + $0x1], 0 }
   0x2   :  { %11 = vsyncpa [#allocation6], 0 }
   0x3   :  { %12 = vsyncpa [#allocation4], 0 }
   0x4   :  { %14 = vsyncpa [#allocation4 + $0x1], 0  ;;  %s2111_s12 = smov 0   ;;  %s2113_s13 = smov 0  }
   0x5   :  { %s2115_s14 = smov 0   ;;  %s2117_s15 = smov 0  }
   0x6   :  { %s2119_s16 = smov 0   ;;  %s2121_s17 = smov 0  }
   0x7 LB: > { %s1617_s18 = sadd.s32 4294967295, %s2067_s17   ;;  %s1618_s19 = sadd.s32 4294967294, %s2067_s17   ;;  %s2067_s17 = sphi %s2121_s17, %s20_s17   ;;  %s2063_s16 = sphi %s2119_s16, %s2522_s16   ;;  %s2059_s15 = sphi %s2117_s15, %s2521_s15   ;;  %s2055_s14 = sphi %s2115_s14, %s2520_s14   ;;  %s2051_s13 = sphi %s2113_s13, %s2519_s13   ;;  %s2047_s12 = sphi %s2111_s12, %s2518_s12  }
   0x8   : > { %p61_p0 = scmp.ne.s32.totalorder %s2051_s13, %s2047_s12  ;;  %p2145_p1 = scmp.eq.s32.totalorder %s1617_s18, 0 }
   0x9   : > { %p2149_p2 = scmp.eq.s32.totalorder %s1617_s18, 1  ;;  %p147_p3 = scmp.eq.s32.totalorder %s1618_s19, 1 }
   0xa   : > { %s2505_s20 = scalar_select %p2145_p1, 1, 0 }
   0xb   : > { %p2155_p4 = por %p2145_p1, %p61_p0  ;;  %p1619_p5 = scmp.ge.s32.totalorder %s2067_s17, 1 }
   0xc   : > { %p2160_p6 = por %p147_p3, %p61_p0  ;;  %p154_p7 = scmp.lt.s32.totalorder %s2067_s17, 3 }
   0xd   : > { %s2507_s22 = scalar_select %p2155_p4, 1, 0 }
   0xe   : > { %s2508_s23 = scalar_select %p2160_p6, 1, 0 }
   0xf   : > { %p2165_p8 = pnand %p1619_p5, %p154_p7  ;;  %s2069_s25 = smov [#allocation5]  }
  0x10   : > { %s169_s26 = sshll.u32 %s2069_s25, 4  ;;  %s2070_s28 = smov [#allocation7]   ;;  %s2169_s26 = int_to_ptr.vmem [resolvable:$true] %s169_s26 }
  0x11   : > { %p1787_p9 = pneg %p2165_p8  ;;  %s185_s29 = sshll.u32 %s2070_s28, 4  ;;  %s2180_s29 = int_to_ptr.vmem [resolvable:$true] %s185_s29 }
  0x12   : > { %s1895_s5 = scalar_lea.hbm %s2498_s1, 1152 }
  0x13   : > { %p2176_p11 = pnand %p1787_p9, %p2145_p1  ;;  %p1896_p12 = scmp.ne.s32.totalorder %s2498_s1, %s1895_s5 }
  0x14   : > { %p1902_p5 = scmp.lt.u32.totalorder %s1895_s5, %s2498_s1 }
  0x15   : > { %p1897_p13 = pneg %p2176_p11 }
  0x17   : > { %p1898_p0 = pnand %p1897_p13, %p1896_p12 }
  0x19   : > { %p1899_p3 = pneg %p1898_p0 }
  0x1b   : > { %p1904_p7 = pnand %p1902_p5, %p1899_p3 }
  0x1d   : > { %1907 = shalt.err (!%p1904_p7)
}
  0x1e   : > { %s1908_s10 = scalar_lea.vmem %s2169_s26, 1152  ;;  %p1916_p1 = scmp.lt.s32.totalorder %s2169_s26, %s2169_s26 }
  0x1f   : > { %p1909_p9 = scmp.ne.s32.totalorder %s2169_s26, %s1908_s10  ;;  %p1917_p12 = scmp.lt.s32.totalorder %s1908_s10, %s1908_s10 }
  0x21   : > { %p1911_p10 = pnand %p1909_p9, %p1897_p13  ;;  %p1918_p0 = por %p1917_p12, %p1916_p1 }
  0x23   : > { %p1912_p6 = pneg %p1911_p10 }
  0x25   : > { %p1919_p4 = pnand %p1918_p0, %p1912_p6 }
  0x27   : > { %1922 = shalt.err (!%p1919_p4)
}
  0x28   : > { %s2071_s11 = smov 64   ;;  %s2072_s18 = smov 4  }
  0x29   : > { %1790 = dma.hbm_to_vmem [thread:$0]  (!%p2176_p11), %s2498_s1, 1152, %s2169_s26, [#allocation6], %s2071_s11, %s2071_s11, %s2072_s18  }
  0x2a   : > { %s1923_s4 = scalar_lea.hbm %s2499_s2, 256 }
  0x2b   : > { %p1924_p1 = scmp.ne.s32.totalorder %s2499_s2, %s1923_s4  ;;  %p1930_p10 = scmp.lt.u32.totalorder %s1923_s4, %s2499_s2 }
  0x2d   : > { %p1926_p4 = pnand %p1924_p1, %p1897_p13 }
  0x2f   : > { %p1927_p6 = pneg %p1926_p4 }
  0x31   : > { %p1932_p3 = pnand %p1930_p10, %p1927_p6 }
  0x33   : > { %1935 = shalt.err (!%p1932_p3)
}
  0x34   : > { %s1936_s26 = scalar_lea.vmem %s2180_s29, 256  ;;  %p1944_p12 = scmp.lt.s32.totalorder %s2180_s29, %s2180_s29 }
  0x35   : > { %p1937_p5 = scmp.ne.s32.totalorder %s2180_s29, %s1936_s26  ;;  %p1945_p0 = scmp.lt.s32.totalorder %s1936_s26, %s1936_s26 }
  0x37   : > { %p1939_p7 = pnand %p1937_p5, %p1897_p13  ;;  %p1946_p1 = por %p1945_p0, %p1944_p12 }
  0x39   : > { %p1940_p9 = pneg %p1939_p7 }
  0x3b   : > { %p1947_p4 = pnand %p1946_p1, %p1940_p9 }
  0x3d   : > { %1950 = shalt.err (!%p1947_p4)
}
  0x3e   : > { %s2073_s9 = smov 128   ;;  %s2074_s10 = smov 8  }
  0x3f   : > { %1793 = dma.hbm_to_vmem [thread:$0]  (!%p2176_p11), %s2499_s2, 256, %s2180_s29, [#allocation6], %s2073_s9, %s2073_s9, %s2074_s10  }
  0x40   : > { %s39_s19 = sadd.s32 1, %s2063_s16  ;;  %s48_s25 = sadd.s32 1, %s2055_s14 }
  0x41   : > { %p41_p13 = scmp.ge.s32.totalorder %s39_s19, 2  ;;  %p55_p6 = scmp.ne.s32.totalorder %s2055_s14, %s2051_s13 }
  0x42   : > { %p56_p10 = scmp.eq.s32.totalorder %s2067_s17, 0  ;;  %p1804_p3 = scmp.lt.s32.totalorder %s2067_s17, 2 }
  0x43   : > { %s2524_s19 = smov (%p41_p13, %s39_s19), 0  ;;  %p2244_p7 = por %p2149_p2, %p55_p6 }
  0x44   : > { %p57_p5 = por %p56_p10, %p55_p6  ;;  %s43_s27 = ssub.s32 %s2063_s16, %s2524_s19 }
  0x45   : > { %s2511_s28 = scalar_select %p2244_p7, 1, 0 }
  0x46   : > { %s199_s30 = sand.u32 1, %s2055_s14   ;;  %p46_p9 = scmp.eq.s32.totalorder %s43_s27, 0 }
  0x47   : > { %s1770_s29 = smul.u32 6, %s199_s30  ;;  %p2251_p11 = pnand %p1804_p3, %p57_p5 }
  0x48   : > { %s2256_s5 = scalar_select %p46_p9, %s2055_s14, %s48_s25  }
  0x49   : > { %s1771_s6 = smul.u32 96, %s2063_s16  ;;  %s203_s7 = scalar_lea.vmem [#allocation2], %s1770_s29 }
  0x4a   : > { %s213_s8 = sshll.u32 %s203_s7, 4  ;;  %s200_s10 = scalar_lea.sflag [#allocation3], %s199_s30  ;;  %s2264_s8 = int_to_ptr.vmem [resolvable:$true] %s213_s8 }
  0x4b   : > { %s2262_s9 = scalar_lea.hbm %s2497_s0, %s1771_s6  ;;  %p1953_p12 = pneg %p2251_p11 }
  0x4c   : > { %s1951_s11 = scalar_lea.hbm %s2262_s9, 96  ;;  %s1956_s27 = scalar_lea.hbm %s2497_s0, 192 }
  0x4d   : > { %p1952_p2 = scmp.ne.s32.totalorder %s2262_s9, %s1951_s11  ;;  %p1957_p4 = scmp.lt.u32.totalorder %s2262_s9, %s2497_s0 }
  0x4e   : > { %p1958_p13 = scmp.lt.u32.totalorder %s1956_s27, %s1951_s11  ;;  %p1960_p10 = scmp.lt.u32.totalorder %s1951_s11, %s2262_s9 }
  0x4f   : > { %p1954_p0 = pnand %p1953_p12, %p1952_p2 }
  0x50   : > { %p1959_p6 = por %p1958_p13, %p1957_p4 }
  0x51   : > { %p1955_p1 = pneg %p1954_p0 }
  0x52   : > { %p1961_p3 = por %p1960_p10, %p1959_p6 }
  0x54   : > { %p1962_p5 = pnand %p1961_p3, %p1955_p1 }
  0x56   : > { %1965 = shalt.err (!%p1962_p5)
}
  0x57   : > { %s1966_s30 = scalar_lea.vmem %s2264_s8, 96  ;;  %s2075_s7 = smov [#allocation2]  }
  0x58   : > { %p1967_p9 = scmp.ne.s32.totalorder %s2264_s8, %s1966_s30  ;;  %s1971_s21 = sshll.u32 %s2075_s7, 4  ;;  %s1972_s21 = int_to_ptr.vmem [resolvable:$false] %s1971_s21 }
  0x59   : > { %s1973_s26 = scalar_lea.vmem %s1972_s21, 192  ;;  %p1974_p7 = scmp.lt.s32.totalorder %s2264_s8, %s1972_s21 }
  0x5a   : > { %p1969_p2 = pnand %p1967_p9, %p1953_p12  ;;  %p1975_p4 = scmp.lt.s32.totalorder %s1973_s26, %s1966_s30 }
  0x5c   : > { %p1970_p0 = pneg %p1969_p2  ;;  %p1976_p13 = por %p1975_p4, %p1974_p7 }
  0x5e   : > { %p1977_p6 = pnand %p1976_p13, %p1970_p0 }
  0x60   : > { %1980 = shalt.err (!%p1977_p6)
}
  0x61   : > { %1797 = dma.hbm_to_vmem [thread:$0]  (!%p2251_p11), %s2262_s9, 96, %s2264_s8, %s200_s10  }
  0x62   : > { %222 = sbr.rel (%p2165_p8) target bundleno = 570 (0x23a), region = 32  ;;  %s2294_s11 = sand.u32 (!%p2165_p8), 1, %s2051_s13  }
  0x63   : > { %s1772_s18 = smul.u32 (!%p2165_p8), 6, %s2294_s11  ;;  %s225_s25 = scalar_lea.sflag (!%p2165_p8), [#allocation3], %s2294_s11 }
  0x64   : > { %p2513_p7 = scmp.ne.s32.totalorder (!%p2165_p8), %s2507_s22, 0 }
  0x65   : > { %s2298_s27 = scalar_lea.vmem (!%p2165_p8), [#allocation2], %s1772_s18 }
  0x69   : > { %2034 = dma.done.wait (%p2513_p7), %s225_s25, 96  }
  0x6a   : > { %2036 = vsyncadd (%p2513_p7), %s225_s25, 4294967200  ;;  %p2514_p11 = scmp.ne.s32.totalorder %s2505_s20, 0 }
  0x6c   : > { %2038 = dma.done.wait (%p2514_p11), [#allocation6], 1408  }
  0x6d   : > { %2040 = vsyncadd (%p2514_p11), [#allocation6], 4294965888  ;;  %v279_v0 = vlaneseq  ;;  %v2076_v1 = vmov 1983009808   ;;  %v2077_v4 = vmov 0.0   ;;  %vm2078_vm0 = vmmov 0  }
  0x6e   : > { %v277_v2 = vunpack.c.l.s4 %v2076_v1  ;;  %1684 = vmatprep.subr.bf16.mxu1 %v2077_v4  ;;  %1686 = vmatprep.mubr.msk.bf16.mxu1 %vm2078_vm0, %v2077_v4  ;;  %v2079_v6 = vmov 0   ;;  %v265_v8 = vld [vmem:[%s2298_s27] sm:$0x3f]  ;;  %s2080_s20 = smov 127   ;;  %s2081_s22 = smov 126   ;;  %v1458_v48 = vld [vmem:[#allocation7] sm:$0xff] }
  0x6f   : > { %v280_v3 = vshrl.u32 %v279_v0, 7  ;;  %346 = vmatprep.mubr.bf16.mxu0 %v2079_v6  ;;  %1876 = vset.pattern.permute.xlu0 %v2079_v6  ;;  %v275_v10 = vcombine.high %v265_v8, %v265_v8  ;;  %v502_v11 = vld [vmem:[%s2298_s27] sm:$0x3f]  ;;  %s2082_s24 = smov 110   ;;  %s2083_s4 = smov 109   ;;  %vm304_vm1 = vcmask 1041408  }
  0x70   : > { %v278_v5 = vunpack.c.0.s8 %v277_v2  ;;  %1877 = vset.pattern.permute.xlu1 %v2079_v6  ;;  %v509_v15 = vcombine.high %v502_v11, %v502_v11  ;;  %v639_v16 = vld [vmem:[%s2298_s27] sm:$0x3f]  ;;  %s2084_s8 = smov 108   ;;  %s2085_s9 = smov 92   ;;  %vm297_vm2 = vcmask 1039360   ;;  %v1886_v53 = vld [vmem:[#allocation5 + $0x8] sm:$0xff]  }
  0x71   : > { %v646_v20 = vcombine.high %v639_v16, %v639_v16  ;;  %v776_v22 = vld [vmem:[%s2298_s27] sm:$0x3f]  ;;  %s2086_s10 = smov 91   ;;  %s2087_s29 = smov 90   ;;  %vm300_vm3 = vcmask 31744   ;;  %vm531_vm4 = vcmask 1031168  }
  0x72   : > { %v2313_v7 = vsub.s32 %v278_v5, %v280_v3  ;;  %v783_v25 = vcombine.high %v776_v22, %v776_v22  ;;  %v913_v27 = vld [vmem:[%s2298_s27] sm:$0x3f]  ;;  %v1887_v63 = vld [vmem:[#allocation5] sm:$0xff]   ;;  %vm668_vm5 = vcmask 900096   ;;  %vm805_vm6 = vcmask 891904   ;;  %s1773_s6 = smul.u32 48, %s2294_s11 }
  0x73   : > { %v920_v30 = vcombine.high %v913_v27, %v913_v27  ;;  %v1050_v32 = vld [vmem:[%s2298_s27] sm:$0x3f]  ;;  %vm942_vm7 = vcmask 883712   ;;  %vm1079_vm8 = vcmask 752640   ;;  %vm1216_vm9 = vcmask 744448   ;;  %s1774_s21 = smul.u32 768, %s2059_s15 }
  0x74   : > { %v2318_v9 = vrot.slane %v265_v8, %v2313_v7  ;;  %v2323_v12 = vrot.slane %v275_v10, %v2313_v7  ;;  %v516_v14 = vrot.slane %v502_v11, %v2313_v7  ;;  %v523_v18 = vrot.slane %v509_v15, %v2313_v7  ;;  %v1187_v37 = vld [vmem:[%s2298_s27] sm:$0x3f]  ;;  %s258_s30 = scalar_lea.vmem [#allocation8], %s1773_s6  ;;  %s1484_s15 = scalar_lea.sflag [#allocation4], %s2294_s11 }
  0x75   : > { %v653_v19 = vrot.slane %v639_v16, %v2313_v7  ;;  %v660_v23 = vrot.slane %v646_v20, %v2313_v7  ;;  %v790_v24 = vrot.slane %v776_v22, %v2313_v7  ;;  %v797_v28 = vrot.slane %v783_v25, %v2313_v7  ;;  %v1324_v42 = vld [vmem:[%s2298_s27] sm:$0x3f]  ;;  %s1502_s7 = sshll.u32 %s258_s30, 4  ;;  %s2448_s25 = scalar_lea.hbm %s2500_s3, %s1774_s21  ;;  %s2443_s7 = int_to_ptr.vmem [resolvable:$true] %s1502_s7 }
  0x76   : > { %291 = vrot.lane.b32.xlu0 %v2318_v9, %s2080_s20  ;;  %v2327_v13 = vcombine.high %v2318_v9, %v2318_v9  ;;  %295 = vrot.lane.b32.xlu1 %v2323_v12, %s2080_s20  ;;  %v524_v17 = vcombine.high %v516_v14, %v516_v14  ;;  %v927_v29 = vrot.slane %v913_v27, %v2313_v7  ;;  %v1459_v49 = vld [vmem:[#allocation7 + $0x8] sm:$0xff]  ;;  %v413_v57 = vsel %vm304_vm1, %v2323_v12, 0  ;;  %v1889_v15 = vld [vmem:[#allocation5 + $0x18] sm:$0xff]   ;;  %s1981_s27 = scalar_lea.vmem %s2443_s7, 768  ;;  %p2515_p12 = scmp.ne.s32.totalorder %s2511_s28, 0 }
  0x77   : > { %v661_v21 = vcombine.high %v653_v19, %v653_v19  ;;  %v798_v26 = vcombine.high %v790_v24, %v790_v24  ;;  %v934_v33 = vrot.slane %v920_v30, %v2313_v7  ;;  %v1064_v34 = vrot.slane %v1050_v32, %v2313_v7  ;;  %v1888_v8 = vld [vmem:[#allocation5 + $0x10] sm:$0xff]   ;;  %p1982_p8 = scmp.ne.s32.totalorder %s2443_s7, %s1981_s27 }
  0x78   : > { %v935_v31 = vcombine.high %v927_v29, %v927_v29  ;;  %v1057_v35 = vcombine.high %v1050_v32, %v1050_v32  ;;  %v1201_v39 = vrot.slane %v1187_v37, %v2313_v7  ;;  %v1194_v40 = vcombine.high %v1187_v37, %v1187_v37 }
  0x79   : > { %v1072_v36 = vcombine.high %v1064_v34, %v1064_v34  ;;  %v1338_v44 = vrot.slane %v1324_v42, %v2313_v7  ;;  %v1331_v45 = vcombine.high %v1324_v42, %v1324_v42  ;;  %v407_v60 = vsel %vm304_vm1, %v2318_v9, 0  ;;  %p1983_p1 = pnand %p1982_p8, %p2515_p12 }
  0x7a   : > { %293 = vrot.lane.b32.xlu0 %v2327_v13, %s2080_s20  ;;  %525 = vrot.lane.b32.xlu1 %v516_v14, %s2081_s22  ;;  %v1071_v38 = vrot.slane %v1057_v35, %v2313_v7  ;;  %v1209_v41 = vcombine.high %v1201_v39, %v1201_v39  ;;  %v1208_v43 = vrot.slane %v1194_v40, %v2313_v7  ;;  %vm1353_vm10 = vcmask 736256   ;;  %s2088_s20 = smov [#allocation8]  }
  0x7b   : > { %v1346_v46 = vcombine.high %v1338_v44, %v1338_v44  ;;  %v1345_v47 = vrot.slane %v1331_v45, %v2313_v7  ;;  %vm1478_vm11 = vcmask 261120   ;;  %p1984_p10 = pneg %p1983_p1 }
  0x7e   : > { %527 = vrot.lane.b32.xlu0 %v524_v17, %s2081_s22  ;;  %529 = vrot.lane.b32.xlu1 %v523_v18, %s2081_s22  ;;  %s1985_s22 = sshll.u32 %s2088_s20, 4  ;;  %s1986_s22 = int_to_ptr.vmem [resolvable:$false] %s1985_s22 }
  0x7f   : > { %p1988_p3 = scmp.lt.s32.totalorder %s2443_s7, %s1986_s22 }
  0x82   : > { %662 = vrot.lane.b32.xlu0 %v653_v19, %s2082_s24  ;;  %664 = vrot.lane.b32.xlu1 %v661_v21, %s2082_s24 }
  0x86   : > { %666 = vrot.lane.b32.xlu0 %v660_v23, %s2082_s24  ;;  %799 = vrot.lane.b32.xlu1 %v790_v24, %s2083_s4  ;;  %v1890_v23 = vld [vmem:[#allocation5 + $0x20] sm:$0xff]   ;;  %s1987_s24 = scalar_lea.vmem %s1986_s22, 1536 }
  0x87   : > { %p1989_p5 = scmp.lt.s32.totalorder %s1987_s24, %s1981_s27 }
  0x89   : > { %p1990_p9 = por %p1989_p5, %p1988_p3 }
  0x8a   : > { %801 = vrot.lane.b32.xlu0 %v798_v26, %s2083_s4  ;;  %803 = vrot.lane.b32.xlu1 %v797_v28, %s2083_s4 }
  0x8b   : > { %p1991_p2 = pnand %p1990_p9, %p1984_p10 }
  0x8e   : > { %936 = vrot.lane.b32.xlu0 %v927_v29, %s2084_s8  ;;  %938 = vrot.lane.b32.xlu1 %v935_v31, %s2084_s8  ;;  %v1891_v29 = vld [vmem:[#allocation5 + $0x28] sm:$0xff]  }
  0x92   : > { %940 = vrot.lane.b32.xlu0 %v934_v33, %s2084_s8  ;;  %1073 = vrot.lane.b32.xlu1 %v1064_v34, %s2085_s9 }
  0x96   : > { %1075 = vrot.lane.b32.xlu0 %v1072_v36, %s2085_s9  ;;  %1077 = vrot.lane.b32.xlu1 %v1071_v38, %s2085_s9  ;;  %v1892_v36 = vld [vmem:[#allocation5 + $0x30] sm:$0xff]  }
  0x9a   : > { %1210 = vrot.lane.b32.xlu0 %v1201_v39, %s2086_s10  ;;  %1212 = vrot.lane.b32.xlu1 %v1209_v41, %s2086_s10 }
  0x9e   : > { %1214 = vrot.lane.b32.xlu0 %v1208_v43, %s2086_s10  ;;  %1347 = vrot.lane.b32.xlu1 %v1338_v44, %s2087_s29  ;;  %v1893_v43 = vld [vmem:[#allocation5 + $0x38] sm:$0xff]  }
  0xa2   : > { %1349 = vrot.lane.b32.xlu0 %v1346_v46, %s2087_s29  ;;  %1351 = vrot.lane.b32.xlu1 %v1345_v47, %s2087_s29  ;;  %v1894_v46 = vld [vmem:[#allocation5 + $0x40] sm:$0xff]  }
  0xa6   : > { %1462 = vperm.xlu0 %1876, %v1458_v48   ;;  %1467 = vperm.xlu1 %1877, %v1459_v49  }
  0xe8   : > { %v292_v50 = vpop.permute.xlu0 %291  ;;  %v296_v51 = vpop.permute.xlu1 %295 }
  0xe9   : > { %v312_v52 = vsel %vm304_vm1, %v296_v51, 0 }
  0xea   : > { %1685 = vmatpush3.bf16.msra.mxu1 %v312_v52 }
  0xeb   : > { %1690 = vmatprep.subr.bf16.mxu1 %v2077_v4 }
  0xec   : > { %v294_v54 = vpop.permute.xlu0 %293  ;;  %v526_v59 = vpop.permute.xlu1 %525 }
  0xed   : > { %v299_v55 = vsel %vm297_vm2, %v294_v54, %v296_v51  ;;  %v298_v56 = vsel %vm297_vm2, %v292_v50, %v294_v54  ;;  %1687 = vmatmul.mubr.msk.bf16.vlgmr.msra.gmra.mrb[0].mxu1 %vm300_vm3, %v1886_v53 }
  0xee   : > { %1628 = vmatprep.subr.msk.bf16.mxu0 %vm304_vm1, %v299_v55  ;;  %v306_v58 = vsel %vm304_vm1, %v298_v56, 0  ;;  %1691 = vmatpush3.bf16.msra.mxu1 %v413_v57 }
  0xef   : > { %315 = vmatpush1.bf16.msra.mxu0 %v306_v58  ;;  %1692 = vmatprep.mubr.msk.bf16.mxu1 %vm2078_vm0, %v2077_v4 }
  0xf0   : > { %1632 = vmatprep.subr.msk.bf16.mxu0 %vm304_vm1, %v2327_v13  ;;  %v528_v61 = vpop.permute.xlu0 %527  ;;  %1696 = vmatprep.subr.bf16.mxu1 %v2077_v4  ;;  %v530_v62 = vpop.permute.xlu1 %529 }
  0xf1   : > { %v533_v0 = vsel %vm531_vm4, %v528_v61, %v530_v62  ;;  %v544_v2 = vsel %vm304_vm1, %v530_v62, 0  ;;  %v532_v5 = vsel %vm531_vm4, %v526_v59, %v528_v61 }
  0xf2   : > { %1629 = vmatmul.mubr.msk.bf16.vlgmr.msra.gmra.mrb[0].mxu0 %vm300_vm3, %v1886_v53  ;;  %v538_v9 = vsel %vm304_vm1, %v532_v5, 0 }
  0xf3   : > { %416 = vmatpush1.bf16.msra.mxu0 %v407_v60  ;;  %447 = vmatprep.mubr.bf16.mxu0 %v2079_v6 }
  0xf4   : > { %1636 = vmatprep.subr.msk.bf16.mxu0 %vm304_vm1, %v533_v0  ;;  %v663_v1 = vpop.permute.xlu0 %662  ;;  %v665_v3 = vpop.permute.xlu1 %664 }
  0xf5   : > { %1693 = vmatmul.mubr.msk.bf16.vlgmr.msra.gmra.mrb[4].mxu1 %vm300_vm3, %v1887_v63  ;;  %v669_v17 = vsel %vm668_vm5, %v663_v1, %v665_v3 }
  0xf6   : > { %1697 = vmatpush3.bf16.msra.mxu1 %v544_v2  ;;  %1698 = vmatprep.mubr.msk.bf16.mxu1 %vm2078_vm0, %v2077_v4  ;;  %v675_v20 = vsel %vm304_vm1, %v669_v17, 0 }
  0xf7   : > { %1702 = vmatprep.subr.bf16.mxu1 %v2077_v4 }
  0xf8   : > { %v667_v7 = vpop.permute.xlu0 %666  ;;  %v800_v10 = vpop.permute.xlu1 %799 }
  0xf9   : > { %v681_v11 = vsel %vm304_vm1, %v667_v7, 0  ;;  %v670_v12 = vsel %vm668_vm5, %v665_v3, %v667_v7 }
  0xfc   : > { %v802_v13 = vpop.permute.xlu0 %801  ;;  %v804_v14 = vpop.permute.xlu1 %803 }
  0xfd   : > { %1699 = vmatmul.mubr.msk.bf16.vlgmr.msra.gmra.mrb[8].mxu1 %vm300_vm3, %v1888_v8  ;;  %v818_v18 = vsel %vm304_vm1, %v804_v14, 0  ;;  %v807_v21 = vsel %vm805_vm6, %v802_v13, %v804_v14  ;;  %v806_v27 = vsel %vm805_vm6, %v800_v10, %v802_v13 }
  0xfe   : > { %1633 = vmatmul.mubr.msk.bf16.vlgmr.msra.gmra.mrb[0].mxu0 %vm300_vm3, %v1887_v63  ;;  %1703 = vmatpush3.bf16.msra.mxu1 %v681_v11  ;;  %v812_v30 = vsel %vm304_vm1, %v806_v27, 0 }
  0xff   : > { %547 = vmatpush1.bf16.msra.mxu0 %v538_v9  ;;  %1704 = vmatprep.mubr.msk.bf16.mxu1 %vm2078_vm0, %v2077_v4 }
 0x100   : > { %578 = vmatprep.mubr.bf16.mxu0 %v2079_v6  ;;  %1640 = vmatprep.subr.msk.bf16.mxu0 %vm304_vm1, %v670_v12  ;;  %v937_v16 = vpop.permute.xlu0 %936  ;;  %v939_v19 = vpop.permute.xlu1 %938 }
 0x101   : > { %1708 = vmatprep.subr.bf16.mxu1 %v2077_v4  ;;  %v943_v38 = vsel %vm942_vm7, %v937_v16, %v939_v19 }
 0x102   : > { %v949_v40 = vsel %vm304_vm1, %v943_v38, 0 }
 0x104   : > { %v941_v22 = vpop.permute.xlu0 %940  ;;  %v1074_v24 = vpop.permute.xlu1 %1073 }
 0x105   : > { %1705 = vmatmul.mubr.msk.bf16.vlgmr.msra.gmra.mrb[12].mxu1 %vm300_vm3, %v1889_v15  ;;  %v955_v25 = vsel %vm304_vm1, %v941_v22, 0  ;;  %v944_v33 = vsel %vm942_vm7, %v939_v19, %v941_v22 }
 0x106   : > { %1709 = vmatpush3.bf16.msra.mxu1 %v818_v18  ;;  %1710 = vmatprep.mubr.msk.bf16.mxu1 %vm2078_vm0, %v2077_v4 }
 0x107   : > { %1714 = vmatprep.subr.bf16.mxu1 %v2077_v4 }
 0x108   : > { %v1076_v26 = vpop.permute.xlu0 %1075  ;;  %v1078_v28 = vpop.permute.xlu1 %1077 }
 0x109   : > { %v1092_v32 = vsel %vm304_vm1, %v1078_v28, 0  ;;  %v1081_v41 = vsel %vm1079_vm8, %v1076_v26, %v1078_v28  ;;  %v1080_v45 = vsel %vm1079_vm8, %v1074_v24, %v1076_v26 }
 0x10a   : > { %1637 = vmatmul.mubr.msk.bf16.vlgmr.msra.gmra.mrb[0].mxu0 %vm300_vm3, %v1888_v8  ;;  %v1086_v47 = vsel %vm304_vm1, %v1080_v45, 0 }
 0x10b   : > { %684 = vmatpush1.bf16.msra.mxu0 %v675_v20  ;;  %715 = vmatprep.mubr.bf16.mxu0 %v2079_v6 }
 0x10c   : > { %1644 = vmatprep.subr.msk.bf16.mxu0 %vm304_vm1, %v807_v21  ;;  %v1211_v31 = vpop.permute.xlu0 %1210  ;;  %v1213_v34 = vpop.permute.xlu1 %1212 }
 0x10d   : > { %1711 = vmatmul.mubr.msk.bf16.vlgmr.msra.gmra.mrb[16].mxu1 %vm300_vm3, %v1890_v23  ;;  %v1217_v49 = vsel %vm1216_vm9, %v1211_v31, %v1213_v34 }
 0x10e   : > { %1715 = vmatpush3.bf16.msra.mxu1 %v955_v25  ;;  %1716 = vmatprep.mubr.msk.bf16.mxu1 %vm2078_vm0, %v2077_v4 }
 0x10f   : > { %1720 = vmatprep.subr.bf16.mxu1 %v2077_v4 }
 0x110   : > { %v1215_v35 = vpop.permute.xlu0 %1214  ;;  %v1348_v37 = vpop.permute.xlu1 %1347 }
 0x111   : > { %v1229_v39 = vsel %vm304_vm1, %v1215_v35, 0  ;;  %v1218_v48 = vsel %vm1216_vm9, %v1213_v34, %v1215_v35 }
 0x114   : > { %v1352_v42 = vpop.permute.xlu1 %1351  ;;  %v1350_v50 = vpop.permute.xlu0 %1349 }
 0x115   : > { %1717 = vmatmul.mubr.msk.bf16.vlgmr.msra.gmra.mrb[20].mxu1 %vm300_vm3, %v1891_v29  ;;  %v1366_v44 = vsel %vm304_vm1, %v1352_v42, 0  ;;  %v1355_v51 = vsel %vm1353_vm10, %v1350_v50, %v1352_v42  ;;  %v1354_v52 = vsel %vm1353_vm10, %v1348_v37, %v1350_v50 }
 0x116   : > { %1641 = vmatmul.mubr.msk.bf16.vlgmr.msra.gmra.mrb[0].mxu0 %vm300_vm3, %v1889_v15  ;;  %1721 = vmatpush3.bf16.msra.mxu1 %v1092_v32  ;;  %v1360_v53 = vsel %vm304_vm1, %v1354_v52, 0 }
 0x117   : > { %821 = vmatpush1.bf16.msra.mxu0 %v812_v30  ;;  %1722 = vmatprep.mubr.msk.bf16.mxu1 %vm2078_vm0, %v2077_v4 }
 0x118   : > { %852 = vmatprep.mubr.bf16.mxu0 %v2079_v6  ;;  %1648 = vmatprep.subr.msk.bf16.mxu0 %vm304_vm1, %v944_v33 }
 0x119   : > { %1726 = vmatprep.subr.bf16.mxu1 %v2077_v4 }
 0x11d   : > { %1723 = vmatmul.mubr.msk.bf16.vlgmr.msra.gmra.mrb[24].mxu1 %vm300_vm3, %v1892_v36 }
 0x11e   : > { %1727 = vmatpush3.bf16.msra.mxu1 %v1229_v39  ;;  %1728 = vmatprep.mubr.msk.bf16.mxu1 %vm2078_vm0, %v2077_v4 }
 0x11f   : > { %1732 = vmatprep.subr.bf16.mxu1 %v2077_v4 }
 0x122   : > { %1645 = vmatmul.mubr.msk.bf16.vlgmr.msra.gmra.mrb[0].mxu0 %vm300_vm3, %v1890_v23 }
 0x123   : > { %958 = vmatpush1.bf16.msra.mxu0 %v949_v40  ;;  %989 = vmatprep.mubr.bf16.mxu0 %v2079_v6 }
 0x124   : > { %1652 = vmatprep.subr.msk.bf16.mxu0 %vm304_vm1, %v1081_v41 }
 0x125   : > { %1729 = vmatmul.mubr.msk.bf16.vlgmr.msra.gmra.mrb[28].mxu1 %vm300_vm3, %v1893_v43  ;;  %v1463_v38 = vpop.permute.xlu0 %1462  ;;  %v1468_v42 = vpop.permute.xlu1 %1467 }
 0x126   : > { %1733 = vmatpush3.bf16.msra.mxu1 %v1366_v44  ;;  %1734 = vmatprep.mubr.msk.bf16.mxu1 %vm2078_vm0, %v2077_v4  ;;  %v1223_v4 = vsel %vm304_vm1, %v1217_v49, 0 }
 0x12d   : > { %1735 = vmatmul.mubr.msk.bf16.vlgmr.msra.gmra.mrb[32].mxu1 %vm300_vm3, %v1894_v46 }
 0x12e   : > { %1649 = vmatmul.mubr.msk.bf16.vlgmr.msra.gmra.mrb[0].mxu0 %vm300_vm3, %v1891_v29 }
 0x12f   : > { %1095 = vmatpush1.bf16.msra.mxu0 %v1086_v47  ;;  %1126 = vmatprep.mubr.bf16.mxu0 %v2079_v6 }
 0x130   : > { %1656 = vmatprep.subr.msk.bf16.mxu0 %vm304_vm1, %v1218_v48 }
 0x13a   : > { %1653 = vmatmul.mubr.msk.bf16.vlgmr.msra.gmra.mrb[0].mxu0 %vm300_vm3, %v1892_v36 }
 0x13b   : > { %1232 = vmatpush1.bf16.msra.mxu0 %v1223_v4  ;;  %1263 = vmatprep.mubr.bf16.mxu0 %v2079_v6 }
 0x13c   : > { %1660 = vmatprep.subr.msk.bf16.mxu0 %vm304_vm1, %v1355_v51 }
 0x146   : > { %1657 = vmatmul.mubr.msk.bf16.vlgmr.msra.gmra.mrb[0].mxu0 %vm300_vm3, %v1893_v43 }
 0x147   : > { %1369 = vmatpush1.bf16.msra.mxu0 %v1360_v53  ;;  %1400 = vmatprep.mubr.bf16.mxu0 %v2079_v6 }
 0x152   : > { %1661 = vmatmul.mubr.msk.bf16.vlgmr.msra.gmra.mrb[0].mxu0 %vm300_vm3, %v1894_v46 }
 0x1c0   : > { %v391_v54 = vpop.f32.mrb[0].mxu1 }
 0x1c1   : > { %v1688_v55 = vpop.f32.mrb[1].mxu1 }
 0x1c2   : > { %v394_v56 = vpop.f32.mrb[2].mxu1 }
 0x1c3   : > { %v1689_v57 = vpop.f32.mrb[3].mxu1 }
 0x1c8   : > { %v492_v58 = vpop.f32.mrb[4].mxu1 }
 0x1c9   : > { %v493_v59 = vadd.f32 %v492_v58, %v391_v54  ;;  %v1694_v60 = vpop.f32.mrb[5].mxu1 }
 0x1ca   : > { %v495_v61 = vpop.f32.mrb[6].mxu1 }
 0x1cb   : > { %v496_v62 = vadd.f32 %v495_v61, %v394_v56  ;;  %v1695_v63 = vpop.f32.mrb[7].mxu1 }
 0x1d0   : > { %v623_v0 = vpop.f32.mrb[8].mxu1 }
 0x1d1   : > { %v632_v1 = vadd.f32 %v623_v0, %v493_v59  ;;  %v1700_v2 = vpop.f32.mrb[9].mxu1 }
 0x1d2   : > { %v626_v3 = vpop.f32.mrb[10].mxu1 }
 0x1d3   : > { %v635_v5 = vadd.f32 %v626_v3, %v496_v62  ;;  %v1701_v7 = vpop.f32.mrb[11].mxu1 }
 0x1d8   : > { %v760_v8 = vpop.f32.mrb[12].mxu1 }
 0x1d9   : > { %v769_v6 = vadd.f32 %v760_v8, %v632_v1  ;;  %v1706_v9 = vpop.f32.mrb[13].mxu1 }
 0x1da   : > { %v763_v10 = vpop.f32.mrb[14].mxu1 }
 0x1db   : > { %v772_v11 = vadd.f32 %v763_v10, %v635_v5  ;;  %v1707_v12 = vpop.f32.mrb[15].mxu1 }
 0x1e0   : > { %v897_v13 = vpop.f32.mrb[16].mxu1 }
 0x1e1   : > { %v906_v14 = vadd.f32 %v897_v13, %v769_v6  ;;  %v1712_v15 = vpop.f32.mrb[17].mxu1 }
 0x1e2   : > { %v900_v16 = vpop.f32.mrb[18].mxu1 }
 0x1e3   : > { %v909_v17 = vadd.f32 %v900_v16, %v772_v11  ;;  %v1713_v18 = vpop.f32.mrb[19].mxu1 }
 0x1e8   : > { %v1034_v19 = vpop.f32.mrb[20].mxu1 }
 0x1e9   : > { %v1043_v20 = vadd.f32 %v1034_v19, %v906_v14  ;;  %v1718_v21 = vpop.f32.mrb[21].mxu1 }
 0x1ea   : > { %v1037_v22 = vpop.f32.mrb[22].mxu1 }
 0x1eb   : > { %v1046_v23 = vadd.f32 %v1037_v22, %v909_v17  ;;  %v1719_v24 = vpop.f32.mrb[23].mxu1 }
 0x1f0   : > { %v1171_v25 = vpop.f32.mrb[24].mxu1 }
 0x1f1   : > { %v1180_v26 = vadd.f32 %v1171_v25, %v1043_v20  ;;  %v1724_v27 = vpop.f32.mrb[25].mxu1 }
 0x1f2   : > { %v1174_v28 = vpop.f32.mrb[26].mxu1 }
 0x1f3   : > { %v1183_v29 = vadd.f32 %v1174_v28, %v1046_v23  ;;  %v1725_v30 = vpop.f32.mrb[27].mxu1 }
 0x1f8   : > { %v1308_v31 = vpop.f32.mrb[28].mxu1 }
 0x1f9   : > { %v1317_v32 = vadd.f32 %v1308_v31, %v1180_v26  ;;  %v1730_v33 = vpop.f32.mrb[29].mxu1 }
 0x1fa   : > { %v1311_v34 = vpop.f32.mrb[30].mxu1 }
 0x1fb   : > { %v1320_v35 = vadd.f32 %v1311_v34, %v1183_v29  ;;  %v1731_v36 = vpop.f32.mrb[31].mxu1 }
 0x200   : > { %v1445_v37 = vpop.f32.mrb[32].mxu1 }
 0x201   : > { %v1454_v39 = vadd.f32 %v1445_v37, %v1317_v32  ;;  %v1736_v40 = vpop.f32.mrb[33].mxu1 }
 0x202   : > { %v1448_v41 = vpop.f32.mrb[34].mxu1 }
 0x203   : > { %v1472_v43 = vadd.f32 %v1463_v38, %v1454_v39  ;;  %v1457_v44 = vadd.f32 %v1448_v41, %v1320_v35  ;;  %v1737_v45 = vpop.f32.mrb[35].mxu1 }
 0x205   : > { %1479 = vst.msk [vmem:[%s258_s30 + $0x10] sm:$0xff] %vm1478_vm11, %v1472_v43  ;;  %v1475_v46 = vadd.f32 %v1468_v42, %v1457_v44 }
 0x207   : > { %1482 = vst.msk [vmem:[%s258_s30 + $0x28] sm:$0xff] %vm1478_vm11, %v1475_v46 }
 0x225   : > { %v1402_v47 = vpop.f32.mrb[0].mxu0 }
 0x226   : > { %v1470_v48 = vadd.f32 %v1463_v38, %v1402_v47  ;;  %v1404_v49 = vpop.f32.mrb[1].mxu0 }
 0x227   : > { %v1471_v50 = vadd.f32 %v1463_v38, %v1404_v49  ;;  %v1406_v4 = vpop.f32.mrb[2].mxu0 }
 0x228   : > { %1476 = vst [vmem:[%s258_s30] sm:$0xff] %v1470_v48  ;;  %v1473_v51 = vadd.f32 %v1468_v42, %v1406_v4  ;;  %v1408_v52 = vpop.f32.mrb[3].mxu0 }
 0x229   : > { %1477 = vst [vmem:[%s258_s30 + $0x8] sm:$0xff] %v1471_v50  ;;  %v1474_v53 = vadd.f32 %v1468_v42, %v1408_v52 }
 0x22a   : > { %1480 = vst [vmem:[%s258_s30 + $0x18] sm:$0xff] %v1473_v51 }
 0x22b   : > { %1481 = vst [vmem:[%s258_s30 + $0x20] sm:$0xff] %v1474_v53 }
 0x22c   : > { %1994 = shalt.err (!%p1991_p2)
}
 0x22d   : > { %s1995_s4 = scalar_lea.hbm %s2448_s25, 768  ;;  %s1999_s10 = scalar_lea.hbm %s2500_s3, 1536 }
 0x22e   : > { %p1996_p0 = scmp.ne.s32.totalorder %s2448_s25, %s1995_s4  ;;  %p2000_p6 = scmp.lt.u32.totalorder %s2448_s25, %s2500_s3 }
 0x22f   : > { %p2001_p7 = scmp.lt.u32.totalorder %s1999_s10, %s1995_s4  ;;  %p2003_p8 = scmp.lt.u32.totalorder %s1995_s4, %s2448_s25 }
 0x230   : > { %p1997_p4 = pnand %p1996_p0, %p2515_p12 }
 0x231   : > { %p2002_p11 = por %p2001_p7, %p2000_p6 }
 0x232   : > { %p1998_p13 = pneg %p1997_p4 }
 0x233   : > { %p2004_p1 = por %p2003_p8, %p2002_p11 }
 0x235   : > { %p2005_p10 = pnand %p2004_p1, %p1998_p13 }
 0x237   : > { %2008 = shalt.err (!%p2005_p10)
}
 0x238   : > { %s2089_s30 = smov 384   ;;  %s2090_s21 = smov 24  }
 0x239   : > { %1785 = dma.vmem_to_hbm [thread:$0]  (%p2515_p12), %s2443_s7, 768, %s2448_s25, %s1484_s15, %s2089_s30, %s2089_s30, %s2090_s21  }
 0x23a PF: > { %s1517_s26 = sand.u32 1, %s2047_s12   ;;  %p2516_p3 = scmp.ne.s32.totalorder %s2508_s23, 0 }
 0x23b   : > { %p2517_p5 = scmp.ge.s32.totalorder %s2067_s17, 2  ;;  %s1518_s18 = scalar_lea.sflag [#allocation4], %s1517_s26 }
 0x23d   : > { %p1799_p9 = pnand %p2517_p5, %p2516_p3 }
 0x23f   : > { %2042 = dma.done.wait (!%p1799_p9), %s1518_s18, 768  }
 0x240   : > { %2044 = vsyncadd (!%p1799_p9), %s1518_s18, 4294966528  ;;  %s20_s17 = sadd.s32 1, %s2067_s17   ;;  %s2518_s12 = smov %s2051_s13 }
 0x241   : > { %p17_p2 = scmp.ge.s32.totalorder %s20_s17, 4   ;;  %s2519_s13 = smov %s2055_s14 }
 0x242   : > { %s2520_s14 = smov %s2256_s5  ;;  %s2521_s15 = smov %s2063_s16 }
 0x243   : > { %s2522_s16 = smov %s2524_s19  ;;  %19 = sbr.rel (!%p17_p2) target bundleno = 7 (0x7), region = 95 }
 0x24a   :  { %1523 = vsyncpa [#allocation3], 1 }
 0x24b   :  { %1525 = vsyncpa [#allocation3 + $0x1], 1 }
 0x24c   :  { %1526 = vsyncpa [#allocation6], 1 }
 0x24d   :  { %1527 = vsyncpa [#allocation4], 1 }
 0x24e   :  { %1529 = vsyncpa [#allocation4 + $0x1], 1 }

</bundles_post_ra>
